<compile_context>
chip_gen: v6e
topology: v6e:2x2x1
jax: 0.10.0
libtpu: 0.0.40
codegen_flags: <defaults>
</compile_context>

<pallas_src>
import functools

import jax
import jax.numpy as jnp
from jax.experimental import pallas as pl
from jax.experimental.pallas import tpu as pltpu


def _cdiv(a: int, b: int) -> int:
    return -(-a // b)


def _round_up(v: int, m: int) -> int:
    return _cdiv(v, m) * m


def _tpu_info():
    try:
        return pltpu.get_tpu_info()
    except Exception:
        return None


def _int_attr(obj, names, default):
    if obj is None:
        return default
    for name in names:
        try:
            v = int(getattr(obj, name))
        except Exception:
            continue
        if v > 0:
            return v
    return default


def _vmem_capacity_bytes():
    # Conservative default: v7x has the smallest per-core VMEM (64 MiB).
    return _int_attr(
        _tpu_info(),
        ("vmem_capacity_bytes", "vmem_bytes", "vmem_size_bytes"),
        64 << 20,
    )


def _num_tensorcores():
    # 1 on v5e/v6e; 2 on v7x.  Falls back to 1 (never incorrect, only serial).
    return _int_attr(
        _tpu_info(),
        ("num_tensorcores", "tensorcore_count", "num_cores",
         "cores_per_chip", "num_cores_per_chip"),
        1,
    )


def _make_energy_kernel(*, b_tile, row_tile, L, rows_raw, n_per_split,
                        chunk_rows, n_chunks, grouped):
    groups = chunk_rows // 8 if grouped else 1

    def kernel(x_ref, w_ref, o_ref, acc_ref):
        s = pl.program_id(0)
        r = pl.program_id(2)

        @pl.when(r == 0)
        def _():
            acc_ref[...] = jnp.zeros_like(acc_ref)

        # Intended (unclamped) first atom-row of this grid step; rows at or
        # beyond `rows_raw` must not contribute (ragged edge / clamped blocks).
        row0 = (s * n_per_split + r) * row_tile

        def add_chunk(c, masked):
            if isinstance(c, int):
                start = c * chunk_rows
            else:
                start = pl.multiple_of(c * chunk_rows, 8)
            xv = x_ref[:, pl.ds(start, chunk_rows), :].astype(jnp.float32)
            if masked:
                ri = jax.lax.broadcasted_iota(
                    jnp.int32, (b_tile, chunk_rows, L), 1)
                xv = jnp.where(row0 + start + ri < rows_raw, xv, 0.0)
            if grouped:
                # vreg-aligned partial: sum groups of 8 sublanes (pure VPU adds)
                part = xv.reshape(b_tile, groups, 8, L).sum(axis=1)
            else:
                part = xv.sum(axis=1, keepdims=True)
            acc_ref[...] += part

        def run(masked):
            if n_chunks == 1:
                add_chunk(0, masked)
            else:
                @pl.loop(0, n_chunks)
                def _(c):
                    add_chunk(c, masked)

        needs_mask = row0 + row_tile > rows_raw

        @pl.when(jnp.logical_not(needs_mask))
        def _():
            run(False)

        @pl.when(needs_mask)
        def _():
            run(True)

        @pl.when(r == pl.num_programs(2) - 1)
        def _():
            # One cross-sublane collapse + one weighted lane-reduce per split.
            tot = acc_ref[...].sum(axis=1)                        # [b_tile, L]
            e = (tot * w_ref[...]).sum(axis=-1, keepdims=True)    # [b_tile, 1]
            o_ref[...] = e[None].astype(o_ref.dtype)

    return kernel


@functools.partial(jax.jit, static_argnames=("target_block_bytes", "num_splits"))
def energy_readout(x, w, b, *, target_block_bytes=16 << 20, num_splits=None):
    """x: [B, A, D], w: [D, 1] (transpose of torch's [1, D] weight), b: [1] -> [B, 1]."""
    B, A, D = x.shape
    itemsize = jnp.dtype(x.dtype).itemsize
    out_dtype = x.dtype

    # Hoisted bias contribution: sum_a bias == A * bias.
    bias_term = (jnp.float32(A) * b.astype(jnp.float32)).reshape(1, 1)

    if A == 0 or B == 0:
        return jnp.broadcast_to(bias_term, (B, 1)).astype(out_dtype)

    # ---- lane-dense folding: pack `fold` atoms along the 128-lane axis ------
    # fold is reduced until it divides A, so the reshape below is always a free
    # contiguous reshape -- never a pad/slice that would copy x in HBM.
    if D % 128 == 0 or 128 % D != 0:
        fold = 1
    else:
        fold = 128 // D
        while fold > 1 and A % fold != 0:
            fold //= 2
    L = fold * D
    rows_raw = A // fold               # exact: fold | A
    xr = x.reshape(B, rows_raw, L)     # contiguous reshape: no data movement

    lane_alloc = _round_up(L, 128)     # VMEM lane footprint of one folded row
    row_bytes = lane_alloc * itemsize
    sublane = max(8, 32 // itemsize)   # 8 (f32) / 16 (bf16) / 32 (int8)

    # ---- VMEM budget / streaming-tile sizing (generation aware) -------------
    vmem_cap = min(_vmem_capacity_bytes(), 128 << 20)
    vmem_budget = max(24 << 20, vmem_cap - (8 << 20))
    tgt = max(1 << 20, min(int(target_block_bytes), vmem_budget // 2 - (4 << 20)))

    # Batch tile: full B for normal batch sizes; multiple-of-8 cap for huge B
    # so each per-step DMA stays MiB-scale instead of collapsing row_tile.
    b_tile = B
    if B * sublane * row_bytes > tgt:
        b_tile = max(8, ((tgt // (sublane * row_bytes)) // 8) * 8)
        b_tile = min(b_tile, B)

    # Atom-row tile: as large as the budget allows, never larger than the
    # (sublane-floored) row count so block dims never exceed the array extent.
    if rows_raw <= sublane:
        row_tile = rows_raw
    else:
        row_tile = max(sublane, tgt // (b_tile * row_bytes))
        row_tile = (row_tile // sublane) * sublane
        row_tile = min(row_tile, (rows_raw // sublane) * sublane)

    # In-kernel chunking (~1 MiB per chunk) bounds the traced reduction body
    # regardless of how big the streaming block is.
    chunk_rows = max(8, (((1 << 20) // (b_tile * row_bytes)) // 8) * 8)
    if row_tile <= chunk_rows:
        chunk_rows, n_chunks = row_tile, 1
    else:
        row_tile = (row_tile // chunk_rows) * chunk_rows
        n_chunks = row_tile // chunk_rows
    grouped = (chunk_rows % 8 == 0)
    acc_rows = 8 if grouped else 1

    total_tiles = _cdiv(rows_raw, row_tile)
    n_b_tiles = _cdiv(B, b_tile)

    if num_splits is None:
        num_splits = _num_tensorcores()
    num_splits = max(1, min(int(num_splits), total_tiles))
    n_per_split = _cdiv(total_tiles, num_splits)

    # Lane-tiled weight so that w_t[0, j*D + d] == w[d, 0].
    w_t = jnp.tile(w.reshape(1, D).astype(jnp.float32), (1, fold))   # [1, L]

    kernel = _make_energy_kernel(
        b_tile=b_tile, row_tile=row_tile, L=L, rows_raw=rows_raw,
        n_per_split=n_per_split, chunk_rows=chunk_rows, n_chunks=n_chunks,
        grouped=grouped)

    block_alloc = b_tile * _round_up(row_tile, 8) * lane_alloc * itemsize
    acc_bytes = b_tile * acc_rows * lane_alloc * 4
    vmem_limit = int(min(vmem_budget,
                         max(32 << 20, 2 * block_alloc + acc_bytes + (4 << 20))))

    partials = pl.pallas_call(
        kernel,
        out_shape=jax.ShapeDtypeStruct((num_splits, B, 1), jnp.float32),
        grid_spec=pltpu.PrefetchScalarGridSpec(
            num_scalar_prefetch=0,
            grid=(num_splits, n_b_tiles, n_per_split),
            in_specs=[
                # x: big folded-atom-row tile; clamp the row block index so
                # over-covered iterations re-read the last valid tile (the
                # in-kernel iota mask zeroes their contribution).
                pl.BlockSpec(
                    (b_tile, row_tile, L),
                    lambda s, bt, r: (bt,
                                      jnp.minimum(s * n_per_split + r,
                                                  total_tiles - 1),
                                      0)),
                # weight: tiny, same block every step (fetched once)
                pl.BlockSpec((1, L), lambda s, bt, r: (0, 0)),
            ],
            # one partial-energy block per (split, batch-tile); written once.
            out_specs=pl.BlockSpec((1, b_tile, 1), lambda s, bt, r: (s, bt, 0)),
            scratch_shapes=[pltpu.VMEM((b_tile, acc_rows, L), jnp.float32)],
        ),
        compiler_params=pltpu.CompilerParams(
            dimension_semantics=("parallel", "parallel", "arbitrary"),
            vmem_limit_bytes=vmem_limit,
        ),
        cost_estimate=pl.CostEstimate(
            flops=2 * B * A * D,
            transcendentals=0,
            bytes_accessed=B * A * D * itemsize + (D + num_splits * B + 1) * 4,
        ),
    )(xr, w_t)

    # Combine per-split partials and add the hoisted bias contribution A * b.
    total = partials.sum(axis=0) + bias_term          # [B, 1]
    return total.astype(out_dtype)


if __name__ == "__main__":
    def ref_energy(x, w, b):
        e = jnp.einsum("bad,dk->bak", x, w,
                       precision=jax.lax.Precision.HIGHEST) + b
        return e.sum(axis=1)

    key = jax.random.PRNGKey(0)

    # Small shapes consistent with the module: batch=2, n_atoms=8, n_atom_basis=32.
    B, A, D = 2, 8, 32
    kx, kw, kb = jax.random.split(key, 3)
    x = jax.random.normal(kx, (B, A, D), dtype=jnp.float32)
    # Deterministic nn.Linear(n_atom_basis, 1)-style init (weight stored transposed).
    bound = 1.0 / jnp.sqrt(D)
    w = jax.random.uniform(kw, (D, 1), minval=-bound, maxval=bound, dtype=jnp.float32)
    b = jax.random.uniform(kb, (1,), minval=-bound, maxval=bound, dtype=jnp.float32)

    out = jax.block_until_ready(energy_readout(x, w, b))
    ref = ref_energy(x, w, b)
    assert out.shape == (B, 1), out.shape
    assert jnp.allclose(out, ref, atol=1e-5, rtol=1e-5), (out, ref)

    # Larger ragged case: exercises the in-kernel edge-row mask (250 folded
    # rows, 248-row tiles) without any wrapper-side padding of x.
    A2 = 1000
    x2 = jax.random.normal(jax.random.PRNGKey(1), (B, A2, D), dtype=jnp.float32)
    out2 = jax.block_until_ready(energy_readout(x2, w, b))
    ref2 = ref_energy(x2, w, b)
    assert out2.shape == (B, 1), out2.shape
    assert jnp.allclose(out2, ref2, atol=1e-4, rtol=1e-4), (out2, ref2)

    # Odd atom count: exercises the fold fallback (lane-padded L = D) path.
    A3 = 37
    x3 = jax.random.normal(jax.random.PRNGKey(2), (B, A3, D), dtype=jnp.float32)
    out3 = jax.block_until_ready(energy_readout(x3, w, b))
    ref3 = ref_energy(x3, w, b)
    assert out3.shape == (B, 1), out3.shape
    assert jnp.allclose(out3, ref3, atol=1e-4, rtol=1e-4), (out3, ref3)

    print("KERNEL_OK")
</pallas_src>

<mosaic_0001>
module attributes {stable_mosaic.version = 11 : i64} {
  func.func @kernel(%arg0: i32, %arg1: i32, %arg2: i32, %arg3: memref<2x2x128xf32, #tpu.memory_space<vmem>>, %arg4: memref<1x128xf32, #tpu.memory_space<vmem>>, %arg5: memref<1x2x1xf32, #tpu.memory_space<vmem>>, %arg6: memref<2x1x128xf32, #tpu.memory_space<vmem>>) attributes {dimension_semantics = [#tpu.dimension_semantics<parallel>, #tpu.dimension_semantics<parallel>, #tpu.dimension_semantics<arbitrary>], iteration_bounds = array<i64: 1, 1, 1>, scalar_prefetch = 0 : i64, scratch_operands = 1 : i64, tpu.core_type = #tpu.core_type<tc>, window_params = [{transform_indices = @transform_0, window_bounds = array<i64: 2, 2, 128>}, {pipeline_mode = #tpu.pipeline_mode<synchronous>, transform_indices = @transform_1, window_bounds = array<i64: 1, 128>}, {transform_indices = @transform_2, window_bounds = array<i64: 1, 2, 1>}]} {
    %c0_i32 = arith.constant 0 : i32
    %0 = arith.cmpi eq, %arg2, %c0_i32 : i32
    %1 = arith.extui %0 : i1 to i32
    %c0_i32_0 = arith.constant 0 : i32
    %2 = arith.cmpi ne, %1, %c0_i32_0 : i32
    scf.if %2 {
      %cst = arith.constant 0.000000e+00 : f32
      %16 = vector.broadcast %cst : f32 to vector<2x1x128xf32>
      %c0 = arith.constant 0 : index
      %c0_7 = arith.constant 0 : index
      %c0_8 = arith.constant 0 : index
      %17 = vector.load %arg6[%c0, %c0_7, %c0_8] : memref<2x1x128xf32, #tpu.memory_space<vmem>>, vector<2x1x128xf32>
      tpu.vector_store %arg6[%c0, %c0_7, %c0_8], %16 {strides = array<i32>} : memref<2x1x128xf32, #tpu.memory_space<vmem>>, vector<2x1x128xf32>,
    } else {
    }
    %c1_i32 = arith.constant 1 : i32
    %3 = arith.muli %arg0, %c1_i32 : i32
    %4 = arith.addi %3, %arg2 : i32
    %c2_i32 = arith.constant 2 : i32
    %5 = arith.muli %4, %c2_i32 : i32
    %c2_i32_1 = arith.constant 2 : i32
    %6 = arith.addi %5, %c2_i32_1 : i32
    %c2_i32_2 = arith.constant 2 : i32
    %7 = arith.cmpi sgt, %6, %c2_i32_2 : i32
    %true = arith.constant true
    %8 = arith.xori %7, %true : i1
    %9 = arith.extui %8 : i1 to i32
    %c0_i32_3 = arith.constant 0 : i32
    %10 = arith.cmpi ne, %9, %c0_i32_3 : i32
    scf.if %10 {
      %c0 = arith.constant 0 : index
      %c0_7 = arith.constant 0 : index
      %c0_8 = arith.constant 0 : index
      %16 = vector.load %arg3[%c0, %c0_7, %c0_8] : memref<2x2x128xf32, #tpu.memory_space<vmem>>, vector<2x2x128xf32>
      %cst = arith.constant dense<0.000000e+00> : vector<2x128xf32>
      %17 = vector.multi_reduction <add>, %16, %cst [1] : vector<2x2x128xf32> to vector<2x128xf32>
      %18 = vector.shape_cast %17 : vector<2x128xf32> to vector<2x1x128xf32>
      %c0_9 = arith.constant 0 : index
      %c0_10 = arith.constant 0 : index
      %c0_11 = arith.constant 0 : index
      %19 = vector.load %arg6[%c0_9, %c0_10, %c0_11] : memref<2x1x128xf32, #tpu.memory_space<vmem>>, vector<2x1x128xf32>
      %20 = arith.addf %19, %18 : vector<2x1x128xf32>
      %c0_12 = arith.constant 0 : index
      %c0_13 = arith.constant 0 : index
      %c0_14 = arith.constant 0 : index
      %21 = vector.load %arg6[%c0_12, %c0_13, %c0_14] : memref<2x1x128xf32, #tpu.memory_space<vmem>>, vector<2x1x128xf32>
      tpu.vector_store %arg6[%c0_12, %c0_13, %c0_14], %20 {strides = array<i32>} : memref<2x1x128xf32, #tpu.memory_space<vmem>>, vector<2x1x128xf32>,
    } else {
    }
    %11 = arith.extui %7 : i1 to i32
    %c0_i32_4 = arith.constant 0 : i32
    %12 = arith.cmpi ne, %11, %c0_i32_4 : i32
    scf.if %12 {
      %c0 = arith.constant 0 : index
      %c0_7 = arith.constant 0 : index
      %c0_8 = arith.constant 0 : index
      %16 = vector.load %arg3[%c0, %c0_7, %c0_8] : memref<2x2x128xf32, #tpu.memory_space<vmem>>, vector<2x2x128xf32>
      %17 = tpu.iota {dimensions = array<i32: 1>} : vector<2x2x128xi32>
      %c0_i32_9 = arith.constant 0 : i32
      %18 = arith.addi %5, %c0_i32_9 : i32
      %19 = vector.broadcast %18 : i32 to vector<2x2x128xi32>
      %20 = arith.addi %19, %17 : vector<2x2x128xi32>
      %c2_i32_10 = arith.constant 2 : i32
      %21 = vector.broadcast %c2_i32_10 : i32 to vector<2x2x128xi32>
      %22 = arith.cmpi slt, %20, %21 : vector<2x2x128xi32>
      %cst = arith.constant 0.000000e+00 : f32
      %23 = vector.broadcast %cst : f32 to vector<2x2x128xf32>
      %24 = arith.select %22, %16, %23 : vector<2x2x128xi1>, vector<2x2x128xf32>
      %cst_11 = arith.constant dense<0.000000e+00> : vector<2x128xf32>
      %25 = vector.multi_reduction <add>, %24, %cst_11 [1] : vector<2x2x128xf32> to vector<2x128xf32>
      %26 = vector.shape_cast %25 : vector<2x128xf32> to vector<2x1x128xf32>
      %c0_12 = arith.constant 0 : index
      %c0_13 = arith.constant 0 : index
      %c0_14 = arith.constant 0 : index
      %27 = vector.load %arg6[%c0_12, %c0_13, %c0_14] : memref<2x1x128xf32, #tpu.memory_space<vmem>>, vector<2x1x128xf32>
      %28 = arith.addf %27, %26 : vector<2x1x128xf32>
      %c0_15 = arith.constant 0 : index
      %c0_16 = arith.constant 0 : index
      %c0_17 = arith.constant 0 : index
      %29 = vector.load %arg6[%c0_15, %c0_16, %c0_17] : memref<2x1x128xf32, #tpu.memory_space<vmem>>, vector<2x1x128xf32>
      tpu.vector_store %arg6[%c0_15, %c0_16, %c0_17], %28 {strides = array<i32>} : memref<2x1x128xf32, #tpu.memory_space<vmem>>, vector<2x1x128xf32>,
    } else {
    }
    %c0_i32_5 = arith.constant 0 : i32
    %13 = arith.cmpi eq, %arg2, %c0_i32_5 : i32
    %14 = arith.extui %13 : i1 to i32
    %c0_i32_6 = arith.constant 0 : i32
    %15 = arith.cmpi ne, %14, %c0_i32_6 : i32
    scf.if %15 {
      %c0 = arith.constant 0 : index
      %c0_7 = arith.constant 0 : index
      %c0_8 = arith.constant 0 : index
      %16 = vector.load %arg6[%c0, %c0_7, %c0_8] : memref<2x1x128xf32, #tpu.memory_space<vmem>>, vector<2x1x128xf32>
      %cst = arith.constant dense<0.000000e+00> : vector<2x128xf32>
      %17 = vector.multi_reduction <add>, %16, %cst [1] : vector<2x1x128xf32> to vector<2x128xf32>
      %c0_9 = arith.constant 0 : index
      %c0_10 = arith.constant 0 : index
      %18 = vector.load %arg4[%c0_9, %c0_10] : memref<1x128xf32, #tpu.memory_space<vmem>>, vector<1x128xf32>
      %19 = vector.broadcast %18 : vector<1x128xf32> to vector<2x128xf32>
      %20 = arith.mulf %17, %19 : vector<2x128xf32>
      %cst_11 = arith.constant dense<0.000000e+00> : vector<2xf32>
      %21 = vector.multi_reduction <add>, %20, %cst_11 [1] : vector<2x128xf32> to vector<2xf32>
      %22 = vector.shape_cast %21 : vector<2xf32> to vector<2x1xf32>
      %23 = vector.shape_cast %22 : vector<2x1xf32> to vector<1x2x1xf32>
      %c0_12 = arith.constant 0 : index
      %c0_13 = arith.constant 0 : index
      %c0_14 = arith.constant 0 : index
      %24 = vector.load %arg5[%c0_12, %c0_13, %c0_14] : memref<1x2x1xf32, #tpu.memory_space<vmem>>, vector<1x2x1xf32>
      tpu.vector_store %arg5[%c0_12, %c0_13, %c0_14], %23 {strides = array<i32>} : memref<1x2x1xf32, #tpu.memory_space<vmem>>, vector<1x2x1xf32>,
    } else {
    }
    return
  }
  func.func @transform_0(%arg0: i32, %arg1: i32, %arg2: i32) -> (i32, i32, i32) {
    %c1_i32 = arith.constant 1 : i32
    %0 = arith.muli %arg0, %c1_i32 : i32
    %1 = arith.addi %0, %arg2 : i32
    %c0_i32 = arith.constant 0 : i32
    %2 = arith.minsi %1, %c0_i32 : i32
    %c0_i32_0 = arith.constant 0 : i32
    %c0_i32_1 = arith.constant 0 : i32
    return %arg1, %2, %c0_i32_0 : i32, i32, i32
  }
  func.func @transform_1(%arg0: i32, %arg1: i32, %arg2: i32) -> (i32, i32) {
    %c0_i32 = arith.constant 0 : i32
    %c0_i32_0 = arith.constant 0 : i32
    %c0_i32_1 = arith.constant 0 : i32
    return %c0_i32, %c0_i32_0 : i32, i32
  }
  func.func @transform_2(%arg0: i32, %arg1: i32, %arg2: i32) -> (i32, i32, i32) {
    %c0_i32 = arith.constant 0 : i32
    %c0_i32_0 = arith.constant 0 : i32
    return %arg0, %arg1, %c0_i32 : i32, i32, i32
  }
}

</mosaic_0001>

<bundles_post_ra>
// kernel: energy_readout.1
= control target key start
LH: loop header
LB: loop body
LE: loop exit
PB: predicated region body
PF: predicated region fallthrough
CT: control target
= control target key end

     0   :  { %vm54_vm0 = vcmask 1041408   ;;  %v184_v0 = vmov 0.0   ;;  %v185_v3 = vmov 1966171168   ;;  %v124_v5 = vlaneseq  ;;  %s216_s0 = inlined_call_operand.vmem [shape: f32[2,2,128], index: 0, kind: input, shape index: {}]   ;;  %s217_s1 = inlined_call_operand.vmem [shape: f32[1,128], index: 1, kind: input, shape index: {}]   ;;  %s218_s2 = inlined_call_operand.vmem [shape: f32[1,2,1], index: 2, kind: output, shape index: {}]  }
   0x1   :  { %42 = vst [vmem:[#allocation2] sm:$0x1] %v184_v0  ;;  %43 = vst [vmem:[#allocation2 + $0x1] sm:$0x1] %v184_v0  ;;  %v52_v1 = vld [vmem:[%s216_s0] sm:$0x3]  ;;  %v122_v4 = vunpack.c.l.s4 %v185_v3 }
   0x2   :  { %v53_v2 = vld [vmem:[%s216_s0 + $0x2] sm:$0x3]  ;;  %v55_v6 = vsel %vm54_vm0, %v52_v1, 0.0  ;;  %v125_v13 = vshrl.u32 %v124_v5, 7  ;;  %v181_v19 = vld [vmem:[%s217_s1] ss:$0 sm:$0xff] }
   0x3   :  { %v62_v7 = vsel %vm54_vm0, %v53_v2, 0.0  ;;  %v56_v8 = vrot.slane %v55_v6, 4  ;;  %v123_v12 = vunpack.c.0.s8 %v122_v4  ;;  %vm169_vm1 = vcmask 1024  }
   0x4   :  { %v63_v9 = vrot.slane %v62_v7, 4 }
   0x5   :  { %v57_v10 = vadd.f32 %v56_v8, %v55_v6  ;;  %v126_v18 = vsub.s32 %v123_v12, %v125_v13 }
   0x6   :  { %v64_v11 = vadd.f32 %v63_v9, %v62_v7 }
   0x7   :  { %v58_v14 = vrot.slane %v57_v10, 2  ;;  %v127_v26 = vrot.slane %v181_v19, %v126_v18 }
   0x8   :  { %v65_v15 = vrot.slane %v64_v11, 2  ;;  %v69_v22 = vld [vmem:[#allocation2] sm:$0x1]  ;;  %v70_v23 = vld [vmem:[#allocation2 + $0x1] sm:$0x1] }
   0x9   :  { %v59_v16 = vadd.f32 %v58_v14, %v57_v10  ;;  %v128_v29 = vcombine.high %v127_v26, %v127_v26  ;;  %v135_v30 = vrot.slane %v127_v26, %v126_v18 }
   0xa   :  { %v66_v17 = vadd.f32 %v65_v15, %v64_v11 }
   0xb   :  { %v60_v20 = vrot.slane %v59_v16, 1  ;;  %v142_v31 = vrot.slane %v128_v29, %v126_v18 }
   0xc   :  { %v67_v21 = vrot.slane %v66_v17, 1 }
   0xd   :  { %v61_v24 = vadd.f32 %v60_v20, %v59_v16 }
   0xe   :  { %v68_v25 = vadd.f32 %v67_v21, %v66_v17 }
   0xf   :  { %v71_v27 = vadd.f32 %v69_v22, %v61_v24 }
  0x10   :  { %v72_v28 = vadd.f32 %v70_v23, %v68_v25 }
  0x11   :  { %73 = vst [vmem:[#allocation2] sm:$0x1] %v71_v27 }
  0x12   :  { %74 = vst [vmem:[#allocation2 + $0x1] sm:$0x1] %v72_v28 }
  0x18   :  { %v111_v32 = vld [vmem:[#allocation2] sm:$0x1] }
  0x19   :  { %v112_v33 = vld [vmem:[#allocation2 + $0x1] sm:$0x1]  ;;  %v145_v34 = vmul.f32 %v135_v30, %v111_v32 }
  0x1a   :  { %v146_v35 = vmul.f32 %v142_v31, %v112_v33 }
  0x1c   :  { %v149_v36 = vcombine.low %v145_v34, %v146_v35 }
  0x1e   :  { %v156_v37 = vrot.slane %v149_v36, %v126_v18 }
  0x20   :  { %v163_v38 = vrot.slane %v156_v37, %v126_v18 }
  0x22   :  { %v166_v39 = vsel %vm54_vm0, %v163_v38, 0.0 }
  0x23   :  { %167 = vadd.xlane.f32.xlu0 %v166_v39 }
  0xac   :  { %v168_v40 = vpop.xlane.xlu0 %167 }
  0xad   :  { %170 = vst.msk [vmem:[%s218_s2] sm:$0x3] %vm169_vm1, %v168_v40 }

</bundles_post_ra>
